<compile_context>
chip_gen: v7x
topology: tpu7x:2x2x1
jax: 0.10.0
libtpu: 0.0.40
codegen_flags: <defaults>
</compile_context>

<pallas_src>
import numpy as np
import jax
import jax.numpy as jnp
from jax import lax
from jax.experimental import pallas as pl
from jax.experimental.pallas import tpu as pltpu

# ---------------- synthetic ExpConfig ----------------
OPERATION_CNT = 8            # DatasetParams.operation_cnt
LATENCY_FEATURE_SIZE = 16    # Model.latency_feature_size (TreeLSTM hidden size H)
LATENCY_FEATURE_LENGTH = 4   # Latency.latency_feature_length (L)
NODES_PER_TREE = 8
NUM_TREES = 2
OUT_LANES = 128              # lane-dense packed output width

_F32 = jnp.float32
_VMEM = pl.BlockSpec(memory_space=pltpu.MemorySpace.VMEM)


# ---------------- fused kernel ----------------
def _tree_lstm_latency_decoder_kernel(
        z_ref, child_ref, lvl_ref, op_ref,
        w_iou_ref, u_iou_ref, b_iou_ref, u_f_ref, b_f_ref,
        w_head_ref, b_head_ref,
        op_tab_ref, r_comb_ref, s_pad_ref,
        out_ref):
    """Whole TreeLSTMLatencyDecoder forward; every intermediate stays in VMEM."""
    x = z_ref[...]                                  # (N, H)
    n, hid = x.shape
    num_levels = lvl_ref.shape[1]
    child = child_ref[...]                          # (N, N) child[p, c]
    u_iou = u_iou_ref[...]
    u_f = u_f_ref[...]
    b_f = b_f_ref[...]

    # Input projection for every node (shared across levels).
    wx = jnp.dot(x, w_iou_ref[...], preferred_element_type=_F32) + b_iou_ref[...]  # (N, 3H)

    # Child-sum TreeLSTM, level-synchronous bottom-up (deepest level first).
    h = jnp.zeros((n, hid), dtype=_F32)
    c = jnp.zeros((n, hid), dtype=_F32)
    for d in range(num_levels - 1, -1, -1):
        mask = lvl_ref[:, d:d + 1]                                          # (N, 1)
        fgt = jax.nn.sigmoid(jnp.dot(h, u_f, preferred_element_type=_F32) + b_f)
        h_sum = jnp.dot(child, h, preferred_element_type=_F32)              # sum_k h_k
        c_sum = jnp.dot(child, fgt * c, preferred_element_type=_F32)        # sum_k f_k*c_k
        iou = wx + jnp.dot(h_sum, u_iou, preferred_element_type=_F32)       # (N, 3H)
        i_g = jax.nn.sigmoid(iou[:, :hid])
        o_g = jax.nn.sigmoid(iou[:, hid:2 * hid])
        u_g = jnp.tanh(iou[:, 2 * hid:])
        c_new = i_g * u_g + c_sum
        h_new = o_g * jnp.tanh(c_new)
        h = h + mask * (h_new - h)                   # update only nodes at depth d
        c = c + mask * (c_new - c)

    y = h                                            # (N, H) TreeLSTM output

    # Fused linear output heads:  head = [ mu | logvar ]  (N, 2L).
    head = jnp.dot(y, w_head_ref[...], preferred_element_type=_F32) + b_head_ref[...]

    # op_wise_output embedding gather, in-kernel as a one-hot matmul.
    op_cnt_p1 = op_tab_ref.shape[0]
    onehot = (op_ref[...] ==
              lax.broadcasted_iota(jnp.int32, (n, op_cnt_p1), 1)).astype(_F32)     # (N, OP+1)
    opw = jnp.dot(onehot, op_tab_ref[...], preferred_element_type=_F32)            # (N, 2*L*L)
    # flat layout of opw matches torch .reshape(-1,1,L,2L): opw[n, f*2L + j],
    #   j <  L -> w_mu[n, f, j]      ;  j >= L -> w_logvar[n, f, j-L]

    # Per-node (1xL)@(LxL) for BOTH heads via two constant layout maps:
    #   bcast[n, f*2L+j] = mu[n, f]  if j <  L      (R map, rows 0..L-1)
    #                    = lv[n, f]  if j >= L      (R map, rows L..2L-1)
    #   out[n, j]        = sum_f bcast[n, f*2L+j] * opw[n, f*2L+j]   (S map)
    # S is pre-padded to 128 output lanes => the matmul result IS the packed
    # [ mu | logvar | zero pad ] output; single unmasked full-lane store.
    bcast = jnp.dot(head, r_comb_ref[...], preferred_element_type=_F32)            # (N, 2*L*L)
    out_ref[...] = jnp.dot(bcast * opw, s_pad_ref[...],
                           preferred_element_type=_F32)                             # (N, 128)


# ---------------- wrapper ----------------
def tree_lstm_latency_decoder_forward(fused, graph, z_latency):
    n, n_z, _ = z_latency.shape
    assert n_z == 1  # TODO(synk): n_z > 1 (multi-sample VAE path) would vmap over the sample dim.
    lat = LATENCY_FEATURE_LENGTH
    assert 2 * lat <= OUT_LANES

    x = z_latency[:, 0, :]                                         # (N, H)
    op_id = graph['operation_id'].reshape(n, 1).astype(jnp.int32)  # (N, 1)

    args = (x, graph['child'], graph['levels'], op_id,
            fused['w_iou'], fused['u_iou'], fused['b_iou'],
            fused['u_f'], fused['b_f'],
            fused['w_head'], fused['b_head'],
            fused['op_wise'], fused['r_comb'], fused['s_pad'])

    packed = pl.pallas_call(
        _tree_lstm_latency_decoder_kernel,
        out_shape=jax.ShapeDtypeStruct((n, OUT_LANES), _F32),
        in_specs=[_VMEM] * len(args),
        out_specs=_VMEM,
    )(*args)

    mu = packed[:, :lat].reshape(n, n_z, lat)
    logvar = packed[:, lat:2 * lat].reshape(n, n_z, lat)
    return mu, logvar


# ---------------- parameters (deterministic synthetic init) ----------------
def init_params(key):
    def nrm(k, shape, scale):
        return scale * jax.random.normal(k, shape, dtype=_F32)

    ks = iter(jax.random.split(key, 16))
    H = LATENCY_FEATURE_SIZE
    L = LATENCY_FEATURE_LENGTH
    return {
        # TreeLSTM (child-sum cell)
        'w_iou': nrm(next(ks), (H, 3 * H), 0.3),
        'u_iou': nrm(next(ks), (H, 3 * H), 0.3),
        'b_iou': nrm(next(ks), (1, 3 * H), 0.1),
        'u_f':   nrm(next(ks), (H, H), 0.3),
        'b_f':   nrm(next(ks), (1, H), 0.1),
        # linear_output_mu / linear_output_logvar
        'w_mu':  nrm(next(ks), (H, L), 0.3),
        'b_mu':  nrm(next(ks), (1, L), 0.1),
        'w_lv':  nrm(next(ks), (H, L), 0.3),
        'b_lv':  nrm(next(ks), (1, L), 0.1),
        # op_wise_output embedding table
        'op_wise': nrm(next(ks), (OPERATION_CNT + 1, 2 * L * L), 0.3),
    }


def prepare_fused_params(params):
    """Build the fused kernel-side arrays ONCE (no per-call host-side glue)."""
    L = LATENCY_FEATURE_LENGTH
    two_l = 2 * L
    cols = L * two_l

    # Fused output head:  head = y @ w_head + b_head  ->  [ mu | logvar ]
    w_head = jnp.concatenate([params['w_mu'], params['w_lv']], axis=1)   # (H, 2L)
    b_head = jnp.concatenate([params['b_mu'], params['b_lv']], axis=1)   # (1, 2L)

    # Constant 0/1 layout maps implementing reshape(-1,1,L,2L) + split(L,-1) + batched
    # (1xL)@(LxL) for both heads as two plain 2-D matmuls inside the kernel.
    r_comb = np.zeros((two_l, cols), np.float32)      # broadcast map
    s_pad = np.zeros((cols, OUT_LANES), np.float32)   # reduce/pack map (lane-padded)
    for f in range(L):
        for j in range(two_l):
            col = f * two_l + j
            if j < L:
                r_comb[f, col] = 1.0          # mu[n, f] broadcast to w_mu columns
            else:
                r_comb[L + f, col] = 1.0      # lv[n, f] broadcast to w_logvar columns
            s_pad[col, j] = 1.0               # output lane j: j<L -> mu_out, else lv_out

    fused = {
        'w_iou': params['w_iou'], 'u_iou': params['u_iou'], 'b_iou': params['b_iou'],
        'u_f': params['u_f'], 'b_f': params['b_f'],
        'w_head': w_head, 'b_head': b_head,
        'op_wise': params['op_wise'],
        'r_comb': jnp.asarray(r_comb),
        's_pad': jnp.asarray(s_pad),
    }
    return fused


# ---------------- synthetic batched tree graph ----------------
def build_graph(key):
    npg, nt = NODES_PER_TREE, NUM_TREES
    n = nt * npg
    child = np.zeros((n, n), np.float32)
    depth = np.zeros((n,), np.int64)
    for t in range(nt):
        off = t * npg
        for i in range(1, npg):          # binary-tree parent links
            par = (i - 1) // 2
            child[off + par, off + i] = 1.0
            depth[off + i] = depth[off + par] + 1
    num_levels = int(depth.max()) + 1
    levels = np.zeros((n, num_levels), np.float32)
    levels[np.arange(n), depth] = 1.0
    op_id = jax.random.randint(key, (n,), 0, OPERATION_CNT + 1, dtype=jnp.int32)
    graph = {
        'child': jnp.asarray(child),
        'levels': jnp.asarray(levels),
        'operation_id': op_id,
    }
    return graph, n


# ---------------- pure-JAX reference (mirrors the PyTorch forward) ----------------
def reference_forward(params, graph, z_latency):
    hp = jax.lax.Precision.HIGHEST
    n, _, hid = z_latency.shape
    L = params['w_mu'].shape[1]
    x = z_latency[:, 0, :]
    child = graph['child']
    levels = graph['levels']

    wx = jnp.dot(x, params['w_iou'], precision=hp) + params['b_iou']
    h = jnp.zeros((n, hid), dtype=_F32)
    c = jnp.zeros((n, hid), dtype=_F32)
    for d in range(levels.shape[1] - 1, -1, -1):
        mask = levels[:, d:d + 1]
        h_sum = jnp.dot(child, h, precision=hp)
        fgt = jax.nn.sigmoid(jnp.dot(h, params['u_f'], precision=hp) + params['b_f'])
        c_sum = jnp.dot(child, fgt * c, precision=hp)
        iou = wx + jnp.dot(h_sum, params['u_iou'], precision=hp)
        i_g = jax.nn.sigmoid(iou[:, :hid])
        o_g = jax.nn.sigmoid(iou[:, hid:2 * hid])
        u_g = jnp.tanh(iou[:, 2 * hid:])
        c_new = i_g * u_g + c_sum
        h_new = o_g * jnp.tanh(c_new)
        h = mask * h_new + (1.0 - mask) * h
        c = mask * c_new + (1.0 - mask) * c

    mu = jnp.dot(h, params['w_mu'], precision=hp) + params['b_mu']
    lv = jnp.dot(h, params['w_lv'], precision=hp) + params['b_lv']

    w = params['op_wise'][graph['operation_id']].reshape(n, L, 2 * L)
    w_mu, w_lv = w[:, :, :L], w[:, :, L:]                         # torch split(L, dim=-1)
    mu_out = jnp.einsum('nf,nfo->no', mu, w_mu, precision=hp)
    lv_out = jnp.einsum('nf,nfo->no', lv, w_lv, precision=hp)
    return mu_out.reshape(n, 1, L), lv_out.reshape(n, 1, L)


if __name__ == "__main__":
    key = jax.random.PRNGKey(0)
    kp, kg, kz = jax.random.split(key, 3)
    params = init_params(kp)
    fused = prepare_fused_params(params)
    graph, n_nodes = build_graph(kg)
    z_latency = jax.random.normal(
        kz, (n_nodes, 1, LATENCY_FEATURE_SIZE), dtype=_F32)        # (N, n_z=1, H)

    mu, logvar = jax.block_until_ready(
        tree_lstm_latency_decoder_forward(fused, graph, z_latency))

    ref_mu, ref_lv = reference_forward(params, graph, z_latency)
    np.testing.assert_allclose(np.asarray(mu), np.asarray(ref_mu), rtol=2e-2, atol=2e-2)
    np.testing.assert_allclose(np.asarray(logvar), np.asarray(ref_lv), rtol=2e-2, atol=2e-2)

    print("KERNEL_OK")
</pallas_src>

<mosaic_0001>
module attributes {stable_mosaic.version = 11 : i64} {
  func.func @_tree_lstm_latency_decoder_kernel(%arg0: memref<16x16xf32, #tpu.memory_space<vmem>>, %arg1: memref<16x16xf32, #tpu.memory_space<vmem>>, %arg2: memref<16x4xf32, #tpu.memory_space<vmem>>, %arg3: memref<16x1xi32, #tpu.memory_space<vmem>>, %arg4: memref<16x48xf32, #tpu.memory_space<vmem>>, %arg5: memref<16x48xf32, #tpu.memory_space<vmem>>, %arg6: memref<1x48xf32, #tpu.memory_space<vmem>>, %arg7: memref<16x16xf32, #tpu.memory_space<vmem>>, %arg8: memref<1x16xf32, #tpu.memory_space<vmem>>, %arg9: memref<16x8xf32, #tpu.memory_space<vmem>>, %arg10: memref<1x8xf32, #tpu.memory_space<vmem>>, %arg11: memref<9x32xf32, #tpu.memory_space<vmem>>, %arg12: memref<8x32xf32, #tpu.memory_space<vmem>>, %arg13: memref<32x128xf32, #tpu.memory_space<vmem>>, %arg14: memref<16x128xf32, #tpu.memory_space<vmem>>) attributes {dimension_semantics = [], scalar_prefetch = 0 : i64, scratch_operands = 0 : i64, tpu.core_type = #tpu.core_type<tc>} {
    %c0 = arith.constant 0 : index
    %c0_0 = arith.constant 0 : index
    %0 = vector.load %arg0[%c0, %c0_0] : memref<16x16xf32, #tpu.memory_space<vmem>>, vector<16x16xf32>
    %c0_1 = arith.constant 0 : index
    %c0_2 = arith.constant 0 : index
    %1 = vector.load %arg1[%c0_1, %c0_2] : memref<16x16xf32, #tpu.memory_space<vmem>>, vector<16x16xf32>
    %c0_3 = arith.constant 0 : index
    %c0_4 = arith.constant 0 : index
    %2 = vector.load %arg5[%c0_3, %c0_4] : memref<16x48xf32, #tpu.memory_space<vmem>>, vector<16x48xf32>
    %c0_5 = arith.constant 0 : index
    %c0_6 = arith.constant 0 : index
    %3 = vector.load %arg7[%c0_5, %c0_6] : memref<16x16xf32, #tpu.memory_space<vmem>>, vector<16x16xf32>
    %c0_7 = arith.constant 0 : index
    %c0_8 = arith.constant 0 : index
    %4 = vector.load %arg8[%c0_7, %c0_8] : memref<1x16xf32, #tpu.memory_space<vmem>>, vector<1x16xf32>
    %c0_9 = arith.constant 0 : index
    %c0_10 = arith.constant 0 : index
    %5 = vector.load %arg4[%c0_9, %c0_10] : memref<16x48xf32, #tpu.memory_space<vmem>>, vector<16x48xf32>
    %cst = arith.constant dense<0.000000e+00> : vector<16x48xf32>
    %6 = tpu.matmul %0, %5, %cst {dimension_numbers = #tpu.dot_dimension_numbers<[1], [0], [0], [1], [0, 0, 1, 1], [], []>} : vector<16x16xf32>, vector<16x48xf32>, vector<16x48xf32> -> vector<16x48xf32>
    %c0_11 = arith.constant 0 : index
    %c0_12 = arith.constant 0 : index
    %7 = vector.load %arg6[%c0_11, %c0_12] : memref<1x48xf32, #tpu.memory_space<vmem>>, vector<1x48xf32>
    %8 = vector.broadcast %7 : vector<1x48xf32> to vector<16x48xf32>
    %9 = arith.addf %6, %8 : vector<16x48xf32>
    %cst_13 = arith.constant 0.000000e+00 : f32
    %10 = vector.broadcast %cst_13 : f32 to vector<16x16xf32>
    %cst_14 = arith.constant 0.000000e+00 : f32
    %11 = vector.broadcast %cst_14 : f32 to vector<16x16xf32>
    %c0_15 = arith.constant 0 : index
    %c3 = arith.constant 3 : index
    %12 = vector.load %arg2[%c0_15, %c3] : memref<16x4xf32, #tpu.memory_space<vmem>>, vector<16x1xf32>
    %cst_16 = arith.constant dense<0.000000e+00> : vector<16x16xf32>
    %13 = tpu.matmul %10, %3, %cst_16 {dimension_numbers = #tpu.dot_dimension_numbers<[1], [0], [0], [1], [0, 0, 1, 1], [], []>} : vector<16x16xf32>, vector<16x16xf32>, vector<16x16xf32> -> vector<16x16xf32>
    %14 = vector.broadcast %4 : vector<1x16xf32> to vector<16x16xf32>
    %15 = arith.addf %13, %14 : vector<16x16xf32>
    %16 = arith.negf %15 : vector<16x16xf32>
    %17 = math.exp %16 : vector<16x16xf32>
    %cst_17 = arith.constant 1.000000e+00 : f32
    %18 = vector.broadcast %cst_17 : f32 to vector<16x16xf32>
    %19 = arith.addf %18, %17 : vector<16x16xf32>
    %20 = arith.divf %18, %19 : vector<16x16xf32>
    %cst_18 = arith.constant dense<0.000000e+00> : vector<16x16xf32>
    %21 = tpu.matmul %1, %10, %cst_18 {dimension_numbers = #tpu.dot_dimension_numbers<[1], [0], [0], [1], [0, 0, 1, 1], [], []>} : vector<16x16xf32>, vector<16x16xf32>, vector<16x16xf32> -> vector<16x16xf32>
    %22 = arith.mulf %20, %11 : vector<16x16xf32>
    %cst_19 = arith.constant dense<0.000000e+00> : vector<16x16xf32>
    %23 = tpu.matmul %1, %22, %cst_19 {dimension_numbers = #tpu.dot_dimension_numbers<[1], [0], [0], [1], [0, 0, 1, 1], [], []>} : vector<16x16xf32>, vector<16x16xf32>, vector<16x16xf32> -> vector<16x16xf32>
    %cst_20 = arith.constant dense<0.000000e+00> : vector<16x48xf32>
    %24 = tpu.matmul %21, %2, %cst_20 {dimension_numbers = #tpu.dot_dimension_numbers<[1], [0], [0], [1], [0, 0, 1, 1], [], []>} : vector<16x16xf32>, vector<16x48xf32>, vector<16x48xf32> -> vector<16x48xf32>
    %25 = arith.addf %9, %24 : vector<16x48xf32>
    %26 = vector.extract_strided_slice %25 {offsets = [0, 0], sizes = [16, 16], strides = [1, 1]} : vector<16x48xf32> to vector<16x16xf32>
    %27 = arith.negf %26 : vector<16x16xf32>
    %28 = math.exp %27 : vector<16x16xf32>
    %cst_21 = arith.constant 1.000000e+00 : f32
    %29 = vector.broadcast %cst_21 : f32 to vector<16x16xf32>
    %30 = arith.addf %29, %28 : vector<16x16xf32>
    %31 = arith.divf %29, %30 : vector<16x16xf32>
    %32 = vector.extract_strided_slice %25 {offsets = [0, 16], sizes = [16, 16], strides = [1, 1]} : vector<16x48xf32> to vector<16x16xf32>
    %33 = arith.negf %32 : vector<16x16xf32>
    %34 = math.exp %33 : vector<16x16xf32>
    %cst_22 = arith.constant 1.000000e+00 : f32
    %35 = vector.broadcast %cst_22 : f32 to vector<16x16xf32>
    %36 = arith.addf %35, %34 : vector<16x16xf32>
    %37 = arith.divf %35, %36 : vector<16x16xf32>
    %38 = vector.extract_strided_slice %25 {offsets = [0, 32], sizes = [16, 16], strides = [1, 1]} : vector<16x48xf32> to vector<16x16xf32>
    %39 = math.tanh %38 : vector<16x16xf32>
    %40 = arith.mulf %31, %39 : vector<16x16xf32>
    %41 = arith.addf %40, %23 : vector<16x16xf32>
    %42 = math.tanh %41 : vector<16x16xf32>
    %43 = arith.mulf %37, %42 : vector<16x16xf32>
    %44 = arith.subf %43, %10 : vector<16x16xf32>
    %45 = vector.broadcast %12 : vector<16x1xf32> to vector<16x16xf32>
    %46 = arith.mulf %45, %44 : vector<16x16xf32>
    %47 = arith.addf %10, %46 : vector<16x16xf32>
    %48 = arith.subf %41, %11 : vector<16x16xf32>
    %49 = vector.broadcast %12 : vector<16x1xf32> to vector<16x16xf32>
    %50 = arith.mulf %49, %48 : vector<16x16xf32>
    %51 = arith.addf %11, %50 : vector<16x16xf32>
    %c0_23 = arith.constant 0 : index
    %c2 = arith.constant 2 : index
    %52 = vector.load %arg2[%c0_23, %c2] : memref<16x4xf32, #tpu.memory_space<vmem>>, vector<16x1xf32>
    %cst_24 = arith.constant dense<0.000000e+00> : vector<16x16xf32>
    %53 = tpu.matmul %47, %3, %cst_24 {dimension_numbers = #tpu.dot_dimension_numbers<[1], [0], [0], [1], [0, 0, 1, 1], [], []>} : vector<16x16xf32>, vector<16x16xf32>, vector<16x16xf32> -> vector<16x16xf32>
    %54 = vector.broadcast %4 : vector<1x16xf32> to vector<16x16xf32>
    %55 = arith.addf %53, %54 : vector<16x16xf32>
    %56 = arith.negf %55 : vector<16x16xf32>
    %57 = math.exp %56 : vector<16x16xf32>
    %cst_25 = arith.constant 1.000000e+00 : f32
    %58 = vector.broadcast %cst_25 : f32 to vector<16x16xf32>
    %59 = arith.addf %58, %57 : vector<16x16xf32>
    %60 = arith.divf %58, %59 : vector<16x16xf32>
    %cst_26 = arith.constant dense<0.000000e+00> : vector<16x16xf32>
    %61 = tpu.matmul %1, %47, %cst_26 {dimension_numbers = #tpu.dot_dimension_numbers<[1], [0], [0], [1], [0, 0, 1, 1], [], []>} : vector<16x16xf32>, vector<16x16xf32>, vector<16x16xf32> -> vector<16x16xf32>
    %62 = arith.mulf %60, %51 : vector<16x16xf32>
    %cst_27 = arith.constant dense<0.000000e+00> : vector<16x16xf32>
    %63 = tpu.matmul %1, %62, %cst_27 {dimension_numbers = #tpu.dot_dimension_numbers<[1], [0], [0], [1], [0, 0, 1, 1], [], []>} : vector<16x16xf32>, vector<16x16xf32>, vector<16x16xf32> -> vector<16x16xf32>
    %cst_28 = arith.constant dense<0.000000e+00> : vector<16x48xf32>
    %64 = tpu.matmul %61, %2, %cst_28 {dimension_numbers = #tpu.dot_dimension_numbers<[1], [0], [0], [1], [0, 0, 1, 1], [], []>} : vector<16x16xf32>, vector<16x48xf32>, vector<16x48xf32> -> vector<16x48xf32>
    %65 = arith.addf %9, %64 : vector<16x48xf32>
    %66 = vector.extract_strided_slice %65 {offsets = [0, 0], sizes = [16, 16], strides = [1, 1]} : vector<16x48xf32> to vector<16x16xf32>
    %67 = arith.negf %66 : vector<16x16xf32>
    %68 = math.exp %67 : vector<16x16xf32>
    %cst_29 = arith.constant 1.000000e+00 : f32
    %69 = vector.broadcast %cst_29 : f32 to vector<16x16xf32>
    %70 = arith.addf %69, %68 : vector<16x16xf32>
    %71 = arith.divf %69, %70 : vector<16x16xf32>
    %72 = vector.extract_strided_slice %65 {offsets = [0, 16], sizes = [16, 16], strides = [1, 1]} : vector<16x48xf32> to vector<16x16xf32>
    %73 = arith.negf %72 : vector<16x16xf32>
    %74 = math.exp %73 : vector<16x16xf32>
    %cst_30 = arith.constant 1.000000e+00 : f32
    %75 = vector.broadcast %cst_30 : f32 to vector<16x16xf32>
    %76 = arith.addf %75, %74 : vector<16x16xf32>
    %77 = arith.divf %75, %76 : vector<16x16xf32>
    %78 = vector.extract_strided_slice %65 {offsets = [0, 32], sizes = [16, 16], strides = [1, 1]} : vector<16x48xf32> to vector<16x16xf32>
    %79 = math.tanh %78 : vector<16x16xf32>
    %80 = arith.mulf %71, %79 : vector<16x16xf32>
    %81 = arith.addf %80, %63 : vector<16x16xf32>
    %82 = math.tanh %81 : vector<16x16xf32>
    %83 = arith.mulf %77, %82 : vector<16x16xf32>
    %84 = arith.subf %83, %47 : vector<16x16xf32>
    %85 = vector.broadcast %52 : vector<16x1xf32> to vector<16x16xf32>
    %86 = arith.mulf %85, %84 : vector<16x16xf32>
    %87 = arith.addf %47, %86 : vector<16x16xf32>
    %88 = arith.subf %81, %51 : vector<16x16xf32>
    %89 = vector.broadcast %52 : vector<16x1xf32> to vector<16x16xf32>
    %90 = arith.mulf %89, %88 : vector<16x16xf32>
    %91 = arith.addf %51, %90 : vector<16x16xf32>
    %c0_31 = arith.constant 0 : index
    %c1 = arith.constant 1 : index
    %92 = vector.load %arg2[%c0_31, %c1] : memref<16x4xf32, #tpu.memory_space<vmem>>, vector<16x1xf32>
    %cst_32 = arith.constant dense<0.000000e+00> : vector<16x16xf32>
    %93 = tpu.matmul %87, %3, %cst_32 {dimension_numbers = #tpu.dot_dimension_numbers<[1], [0], [0], [1], [0, 0, 1, 1], [], []>} : vector<16x16xf32>, vector<16x16xf32>, vector<16x16xf32> -> vector<16x16xf32>
    %94 = vector.broadcast %4 : vector<1x16xf32> to vector<16x16xf32>
    %95 = arith.addf %93, %94 : vector<16x16xf32>
    %96 = arith.negf %95 : vector<16x16xf32>
    %97 = math.exp %96 : vector<16x16xf32>
    %cst_33 = arith.constant 1.000000e+00 : f32
    %98 = vector.broadcast %cst_33 : f32 to vector<16x16xf32>
    %99 = arith.addf %98, %97 : vector<16x16xf32>
    %100 = arith.divf %98, %99 : vector<16x16xf32>
    %cst_34 = arith.constant dense<0.000000e+00> : vector<16x16xf32>
    %101 = tpu.matmul %1, %87, %cst_34 {dimension_numbers = #tpu.dot_dimension_numbers<[1], [0], [0], [1], [0, 0, 1, 1], [], []>} : vector<16x16xf32>, vector<16x16xf32>, vector<16x16xf32> -> vector<16x16xf32>
    %102 = arith.mulf %100, %91 : vector<16x16xf32>
    %cst_35 = arith.constant dense<0.000000e+00> : vector<16x16xf32>
    %103 = tpu.matmul %1, %102, %cst_35 {dimension_numbers = #tpu.dot_dimension_numbers<[1], [0], [0], [1], [0, 0, 1, 1], [], []>} : vector<16x16xf32>, vector<16x16xf32>, vector<16x16xf32> -> vector<16x16xf32>
    %cst_36 = arith.constant dense<0.000000e+00> : vector<16x48xf32>
    %104 = tpu.matmul %101, %2, %cst_36 {dimension_numbers = #tpu.dot_dimension_numbers<[1], [0], [0], [1], [0, 0, 1, 1], [], []>} : vector<16x16xf32>, vector<16x48xf32>, vector<16x48xf32> -> vector<16x48xf32>
    %105 = arith.addf %9, %104 : vector<16x48xf32>
    %106 = vector.extract_strided_slice %105 {offsets = [0, 0], sizes = [16, 16], strides = [1, 1]} : vector<16x48xf32> to vector<16x16xf32>
    %107 = arith.negf %106 : vector<16x16xf32>
    %108 = math.exp %107 : vector<16x16xf32>
    %cst_37 = arith.constant 1.000000e+00 : f32
    %109 = vector.broadcast %cst_37 : f32 to vector<16x16xf32>
    %110 = arith.addf %109, %108 : vector<16x16xf32>
    %111 = arith.divf %109, %110 : vector<16x16xf32>
    %112 = vector.extract_strided_slice %105 {offsets = [0, 16], sizes = [16, 16], strides = [1, 1]} : vector<16x48xf32> to vector<16x16xf32>
    %113 = arith.negf %112 : vector<16x16xf32>
    %114 = math.exp %113 : vector<16x16xf32>
    %cst_38 = arith.constant 1.000000e+00 : f32
    %115 = vector.broadcast %cst_38 : f32 to vector<16x16xf32>
    %116 = arith.addf %115, %114 : vector<16x16xf32>
    %117 = arith.divf %115, %116 : vector<16x16xf32>
    %118 = vector.extract_strided_slice %105 {offsets = [0, 32], sizes = [16, 16], strides = [1, 1]} : vector<16x48xf32> to vector<16x16xf32>
    %119 = math.tanh %118 : vector<16x16xf32>
    %120 = arith.mulf %111, %119 : vector<16x16xf32>
    %121 = arith.addf %120, %103 : vector<16x16xf32>
    %122 = math.tanh %121 : vector<16x16xf32>
    %123 = arith.mulf %117, %122 : vector<16x16xf32>
    %124 = arith.subf %123, %87 : vector<16x16xf32>
    %125 = vector.broadcast %92 : vector<16x1xf32> to vector<16x16xf32>
    %126 = arith.mulf %125, %124 : vector<16x16xf32>
    %127 = arith.addf %87, %126 : vector<16x16xf32>
    %128 = arith.subf %121, %91 : vector<16x16xf32>
    %129 = vector.broadcast %92 : vector<16x1xf32> to vector<16x16xf32>
    %130 = arith.mulf %129, %128 : vector<16x16xf32>
    %131 = arith.addf %91, %130 : vector<16x16xf32>
    %c0_39 = arith.constant 0 : index
    %c0_40 = arith.constant 0 : index
    %132 = vector.load %arg2[%c0_39, %c0_40] : memref<16x4xf32, #tpu.memory_space<vmem>>, vector<16x1xf32>
    %cst_41 = arith.constant dense<0.000000e+00> : vector<16x16xf32>
    %133 = tpu.matmul %127, %3, %cst_41 {dimension_numbers = #tpu.dot_dimension_numbers<[1], [0], [0], [1], [0, 0, 1, 1], [], []>} : vector<16x16xf32>, vector<16x16xf32>, vector<16x16xf32> -> vector<16x16xf32>
    %134 = vector.broadcast %4 : vector<1x16xf32> to vector<16x16xf32>
    %135 = arith.addf %133, %134 : vector<16x16xf32>
    %136 = arith.negf %135 : vector<16x16xf32>
    %137 = math.exp %136 : vector<16x16xf32>
    %cst_42 = arith.constant 1.000000e+00 : f32
    %138 = vector.broadcast %cst_42 : f32 to vector<16x16xf32>
    %139 = arith.addf %138, %137 : vector<16x16xf32>
    %140 = arith.divf %138, %139 : vector<16x16xf32>
    %cst_43 = arith.constant dense<0.000000e+00> : vector<16x16xf32>
    %141 = tpu.matmul %1, %127, %cst_43 {dimension_numbers = #tpu.dot_dimension_numbers<[1], [0], [0], [1], [0, 0, 1, 1], [], []>} : vector<16x16xf32>, vector<16x16xf32>, vector<16x16xf32> -> vector<16x16xf32>
    %142 = arith.mulf %140, %131 : vector<16x16xf32>
    %cst_44 = arith.constant dense<0.000000e+00> : vector<16x16xf32>
    %143 = tpu.matmul %1, %142, %cst_44 {dimension_numbers = #tpu.dot_dimension_numbers<[1], [0], [0], [1], [0, 0, 1, 1], [], []>} : vector<16x16xf32>, vector<16x16xf32>, vector<16x16xf32> -> vector<16x16xf32>
    %cst_45 = arith.constant dense<0.000000e+00> : vector<16x48xf32>
    %144 = tpu.matmul %141, %2, %cst_45 {dimension_numbers = #tpu.dot_dimension_numbers<[1], [0], [0], [1], [0, 0, 1, 1], [], []>} : vector<16x16xf32>, vector<16x48xf32>, vector<16x48xf32> -> vector<16x48xf32>
    %145 = arith.addf %9, %144 : vector<16x48xf32>
    %146 = vector.extract_strided_slice %145 {offsets = [0, 0], sizes = [16, 16], strides = [1, 1]} : vector<16x48xf32> to vector<16x16xf32>
    %147 = arith.negf %146 : vector<16x16xf32>
    %148 = math.exp %147 : vector<16x16xf32>
    %cst_46 = arith.constant 1.000000e+00 : f32
    %149 = vector.broadcast %cst_46 : f32 to vector<16x16xf32>
    %150 = arith.addf %149, %148 : vector<16x16xf32>
    %151 = arith.divf %149, %150 : vector<16x16xf32>
    %152 = vector.extract_strided_slice %145 {offsets = [0, 16], sizes = [16, 16], strides = [1, 1]} : vector<16x48xf32> to vector<16x16xf32>
    %153 = arith.negf %152 : vector<16x16xf32>
    %154 = math.exp %153 : vector<16x16xf32>
    %cst_47 = arith.constant 1.000000e+00 : f32
    %155 = vector.broadcast %cst_47 : f32 to vector<16x16xf32>
    %156 = arith.addf %155, %154 : vector<16x16xf32>
    %157 = arith.divf %155, %156 : vector<16x16xf32>
    %158 = vector.extract_strided_slice %145 {offsets = [0, 32], sizes = [16, 16], strides = [1, 1]} : vector<16x48xf32> to vector<16x16xf32>
    %159 = math.tanh %158 : vector<16x16xf32>
    %160 = arith.mulf %151, %159 : vector<16x16xf32>
    %161 = arith.addf %160, %143 : vector<16x16xf32>
    %162 = math.tanh %161 : vector<16x16xf32>
    %163 = arith.mulf %157, %162 : vector<16x16xf32>
    %164 = arith.subf %163, %127 : vector<16x16xf32>
    %165 = vector.broadcast %132 : vector<16x1xf32> to vector<16x16xf32>
    %166 = arith.mulf %165, %164 : vector<16x16xf32>
    %167 = arith.addf %127, %166 : vector<16x16xf32>
    %c0_48 = arith.constant 0 : index
    %c0_49 = arith.constant 0 : index
    %168 = vector.load %arg9[%c0_48, %c0_49] : memref<16x8xf32, #tpu.memory_space<vmem>>, vector<16x8xf32>
    %cst_50 = arith.constant dense<0.000000e+00> : vector<16x8xf32>
    %169 = tpu.matmul %167, %168, %cst_50 {dimension_numbers = #tpu.dot_dimension_numbers<[1], [0], [0], [1], [0, 0, 1, 1], [], []>} : vector<16x16xf32>, vector<16x8xf32>, vector<16x8xf32> -> vector<16x8xf32>
    %c0_51 = arith.constant 0 : index
    %c0_52 = arith.constant 0 : index
    %170 = vector.load %arg10[%c0_51, %c0_52] : memref<1x8xf32, #tpu.memory_space<vmem>>, vector<1x8xf32>
    %171 = vector.broadcast %170 : vector<1x8xf32> to vector<16x8xf32>
    %172 = arith.addf %169, %171 : vector<16x8xf32>
    %c0_53 = arith.constant 0 : index
    %c0_54 = arith.constant 0 : index
    %173 = vector.load %arg3[%c0_53, %c0_54] : memref<16x1xi32, #tpu.memory_space<vmem>>, vector<16x1xi32>
    %174 = tpu.iota {dimensions = array<i32: 1>} : vector<16x9xi32>
    %175 = vector.broadcast %173 : vector<16x1xi32> to vector<16x9xi32>
    %176 = arith.cmpi eq, %175, %174 : vector<16x9xi32>
    %177 = arith.extui %176 : vector<16x9xi1> to vector<16x9xi32>
    %178 = arith.sitofp %177 : vector<16x9xi32> to vector<16x9xf32>
    %c0_55 = arith.constant 0 : index
    %c0_56 = arith.constant 0 : index
    %179 = vector.load %arg11[%c0_55, %c0_56] : memref<9x32xf32, #tpu.memory_space<vmem>>, vector<9x32xf32>
    %cst_57 = arith.constant dense<0.000000e+00> : vector<16x32xf32>
    %180 = tpu.matmul %178, %179, %cst_57 {dimension_numbers = #tpu.dot_dimension_numbers<[1], [0], [0], [1], [0, 0, 1, 1], [], []>} : vector<16x9xf32>, vector<9x32xf32>, vector<16x32xf32> -> vector<16x32xf32>
    %c0_58 = arith.constant 0 : index
    %c0_59 = arith.constant 0 : index
    %181 = vector.load %arg12[%c0_58, %c0_59] : memref<8x32xf32, #tpu.memory_space<vmem>>, vector<8x32xf32>
    %cst_60 = arith.constant dense<0.000000e+00> : vector<16x32xf32>
    %182 = tpu.matmul %172, %181, %cst_60 {dimension_numbers = #tpu.dot_dimension_numbers<[1], [0], [0], [1], [0, 0, 1, 1], [], []>} : vector<16x8xf32>, vector<8x32xf32>, vector<16x32xf32> -> vector<16x32xf32>
    %183 = arith.mulf %182, %180 : vector<16x32xf32>
    %c0_61 = arith.constant 0 : index
    %c0_62 = arith.constant 0 : index
    %184 = vector.load %arg13[%c0_61, %c0_62] : memref<32x128xf32, #tpu.memory_space<vmem>>, vector<32x128xf32>
    %cst_63 = arith.constant dense<0.000000e+00> : vector<16x128xf32>
    %185 = tpu.matmul %183, %184, %cst_63 {dimension_numbers = #tpu.dot_dimension_numbers<[1], [0], [0], [1], [0, 0, 1, 1], [], []>} : vector<16x32xf32>, vector<32x128xf32>, vector<16x128xf32> -> vector<16x128xf32>
    %c0_64 = arith.constant 0 : index
    %c0_65 = arith.constant 0 : index
    %186 = vector.load %arg14[%c0_64, %c0_65] : memref<16x128xf32, #tpu.memory_space<vmem>>, vector<16x128xf32>
    tpu.vector_store %arg14[%c0_64, %c0_65], %185 {strides = array<i32>} : memref<16x128xf32, #tpu.memory_space<vmem>>, vector<16x128xf32>,
    return
  }
}

</mosaic_0001>

<bundles_post_ra>
// kernel: tpu_custom_call.1
= control target key start
LH: loop header
LB: loop body
LE: loop exit
PB: predicated region body
PF: predicated region fallthrough
CT: control target
= control target key end

     0   :  { %19 = vsyncpa [#allocation3], 0  ;;  %s3133_s0 = inlined_call_operand.vmem [shape: f32[16,16], index: 0, kind: input, shape index: {}]   ;;  %s3134_s1 = inlined_call_operand.vmem [shape: f32[16,16], index: 1, kind: input, shape index: {}]   ;;  %s3135_s2 = inlined_call_operand.vmem [shape: f32[16,4], index: 2, kind: input, shape index: {}]   ;;  %s3136_s3 = inlined_call_operand.vmem [shape: s32[16,1], index: 3, kind: input, shape index: {}]   ;;  %s3137_s4 = inlined_call_operand.hbm [shape: f32[16,48], index: 4, kind: input, shape index: {}]   ;;  %s3138_s5 = inlined_call_operand.hbm [shape: f32[16,48], index: 5, kind: input, shape index: {}]   ;;  %s3139_s6 = inlined_call_operand.vmem [shape: f32[1,48], index: 6, kind: input, shape index: {}]   ;;  %s3140_s7 = inlined_call_operand.vmem [shape: f32[16,16], index: 7, kind: input, shape index: {}]   ;;  %s3141_s8 = inlined_call_operand.vmem [shape: f32[1,16], index: 8, kind: input, shape index: {}]   ;;  %s3142_s9 = inlined_call_operand.vmem [shape: f32[16,8], index: 9, kind: input, shape index: {}]   ;;  %s3143_s10 = inlined_call_operand.hbm [shape: f32[1,8], index: 10, kind: input, shape index: {}]   ;;  %s3144_s11 = inlined_call_operand.vmem [shape: f32[9,32], index: 11, kind: input, shape index: {}]   ;;  %s3145_s12 = inlined_call_operand.vmem [shape: f32[8,32], index: 12, kind: input, shape index: {}]   ;;  %s3146_s13 = inlined_call_operand.vmem [shape: f32[32,128], index: 13, kind: input, shape index: {}]   ;;  %s3147_s14 = inlined_call_operand.hbm [shape: f32[16,128], index: 14, kind: output, shape index: {}]  }
   0x1   :  { %20 = vsyncpa [#allocation6], 0 }
   0x2   :  { %21 = vsyncpa [#allocation4], 0  ;;  %s2728_s29 = smov [#allocation5]   ;;  %s2729_s15 = smov [#allocation2]  }
   0x3   :  { %s47_s30 = sshll.u32 %s2728_s29, 4  ;;  %s35_s16 = sshll.u32 %s2729_s15, 4  ;;  %s48_s30 = int_to_ptr.vmem [resolvable:$true] %s47_s30  ;;  %s2818_s16 = int_to_ptr.vmem [resolvable:$true] %s35_s16 }
   0x4   :  { %s2634_s19 = scalar_lea.hbm %s3138_s5, 256 }
   0x5   :  { %p2635_p0 = scmp.ne.s32.totalorder %s3138_s5, %s2634_s19  ;;  %p2638_p1 = scmp.lt.u32.totalorder %s2634_s19, %s3138_s5 }
   0x7   :  { %p2640_p2 = pnand %p2638_p1, %p2635_p0 }
   0x9   :  { %2643 = shalt.err (!%p2640_p2)
}
   0xa   :  { %s2644_s24 = scalar_lea.vmem %s48_s30, 256  ;;  %p2649_p4 = scmp.lt.s32.totalorder %s48_s30, %s48_s30 }
   0xb   :  { %p2645_p3 = scmp.ne.s32.totalorder %s48_s30, %s2644_s24  ;;  %p2650_p5 = scmp.lt.s32.totalorder %s2644_s24, %s2644_s24 }
   0xd   :  { %p2651_p6 = por %p2650_p5, %p2649_p4 }
   0xf   :  { %p2652_p7 = pnand %p2651_p6, %p2645_p3 }
  0x11   :  { %2655 = shalt.err (!%p2652_p7)
}
  0x12   :  { %s2730_s25 = smov 128   ;;  %s2731_s26 = smov 8  }
  0x13   :  { %53 = dma.hbm_to_vmem [thread:$0]  %s3138_s5, 256, %s48_s30, [#allocation6], %s2730_s25, %s2730_s25, %s2731_s26  }
  0x14   :  { %s2656_s17 = scalar_lea.hbm %s3137_s4, 256 }
  0x15   :  { %p2657_p8 = scmp.ne.s32.totalorder %s3137_s4, %s2656_s17  ;;  %p2660_p9 = scmp.lt.u32.totalorder %s2656_s17, %s3137_s4 }
  0x17   :  { %p2662_p10 = pnand %p2660_p9, %p2657_p8 }
  0x19   :  { %2665 = shalt.err (!%p2662_p10)
}
  0x1a   :  { %s2666_s22 = scalar_lea.vmem %s2818_s16, 256  ;;  %p2671_p12 = scmp.lt.s32.totalorder %s2818_s16, %s2818_s16 }
  0x1b   :  { %p2667_p11 = scmp.ne.s32.totalorder %s2818_s16, %s2666_s22  ;;  %p2672_p13 = scmp.lt.s32.totalorder %s2666_s22, %s2666_s22 }
  0x1d   :  { %p2673_p0 = por %p2672_p13, %p2671_p12 }
  0x1f   :  { %p2674_p1 = pnand %p2673_p0, %p2667_p11 }
  0x21   :  { %2677 = shalt.err (!%p2674_p1)
}
  0x22   :  { %41 = dma.hbm_to_vmem [thread:$0]  %s3137_s4, 256, %s2818_s16, [#allocation3], %s2730_s25, %s2730_s25, %s2731_s26  }
  0x23   :  { %s2732_s23 = smov [#allocation7]   ;;  %s2678_s29 = scalar_lea.hbm %s3143_s10, 16 }
  0x24   :  { %s68_s24 = sshll.u32 %s2732_s23, 4  ;;  %p2679_p2 = scmp.ne.s32.totalorder %s3143_s10, %s2678_s29  ;;  %s69_s24 = int_to_ptr.vmem [resolvable:$true] %s68_s24 }
  0x25   :  { %p2682_p3 = scmp.lt.u32.totalorder %s2678_s29, %s3143_s10 }
  0x27   :  { %p2684_p4 = pnand %p2682_p3, %p2679_p2 }
  0x29   :  { %2687 = shalt.err (!%p2684_p4)
}
  0x2a   :  { %s2688_s20 = scalar_lea.vmem %s69_s24, 16  ;;  %s2692_s4 = scalar_lea.vmem %s69_s24, 32 }
  0x2b   :  { %p2689_p5 = scmp.ne.s32.totalorder %s69_s24, %s2688_s20  ;;  %p2693_p6 = scmp.lt.s32.totalorder %s69_s24, %s69_s24 }
  0x2c   :  { %p2694_p7 = scmp.lt.s32.totalorder %s2692_s4, %s2688_s20 }
  0x2e   :  { %p2695_p8 = por %p2694_p7, %p2693_p6 }
  0x30   :  { %p2696_p9 = pnand %p2695_p8, %p2689_p5 }
  0x32   :  { %2699 = shalt.err (!%p2696_p9)
}
  0x33   :  { %71 = dma.hbm_to_vmem [thread:$0]  %s3143_s10, 16, %s69_s24, [#allocation6]  }
  0x34   :  { %2722 = dma.done.wait [#allocation3], 256  }
  0x35   :  { %2723 = vsyncadd [#allocation3], 4294967040 }
  0x36   :  { %2724 = dma.done.wait [#allocation6], 272  }
  0x37   :  { %2725 = vsyncadd [#allocation6], 4294967024  ;;  %v2733_v0 = vmov 0.0   ;;  %vm105_vm0 = vcmask 130048   ;;  %v2872_v1 = vld [vmem:[%s3134_s1] sm:$0xff]  ;;  %v2877_v2 = vld [vmem:[%s3134_s1 + $0x8] sm:$0xff] }
  0x38   :  { %2301 = vmatprep.subr.mxu0 %v2733_v0  ;;  %v96_v3 = vld [vmem:[#allocation2] sm:$0xff]  ;;  %2303 = vmatprep.mubr.msk.f32.mxu0 %vm105_vm0, %v2872_v1  ;;  %v97_v4 = vld [vmem:[#allocation2 + $0x8] sm:$0xff]  ;;  %v91_v9 = vld [vmem:[#allocation5] sm:$0xff]  ;;  %v2734_v34 = vmov 3   ;;  %s2737_s21 = smov 112   ;;  %vm1871_vm1 = vcmask 1040384  }
  0x39   :  { %2302 = vmatpush3.msra.mxu0 %v2733_v0  ;;  %v87_v5 = vld [vmem:[%s3133_s0] sm:$0xff]  ;;  %v2434_v6 = vpack.c.bf16 %v97_v4, %v96_v3  ;;  %v94_v8 = vld [vmem:[%s3140_s7 + $0x8] sm:$0xff]  ;;  %v92_v11 = vld [vmem:[#allocation5 + $0x8] sm:$0xff]  ;;  %2531 = vset.pattern.permute.xlu1 %v2734_v34  ;;  %vm2741_vm2 = vmmov 1   ;;  %vm1864_vm5 = vcmask 72704   ;;  %vm1951_vm7 = vcmask 64512  }
  0x3a   :  { %2304 = vmatmul.mubr.msk.f32.vlgmr.msra.gmra.mrb[0].mxu0 %vm105_vm0, %v2877_v2  ;;  %2291 = vmatprep.mubr.msk.f32.mxu1 %vm105_vm0, %v87_v5  ;;  %v93_v7 = vld [vmem:[%s3140_s7] sm:$0xff]  ;;  %v2895_v12 = vpack.c.bf16 %v92_v11, %v91_v9  ;;  %v88_v13 = vld [vmem:[%s3133_s0 + $0x8] sm:$0xff]  ;;  %vm2503_vm3 = vmpackc.low %vm1871_vm1, %vm2741_vm2  ;;  %vm2039_vm8 = vcmask 261120   ;;  %s2742_s4 = smov [#allocation8]  }
  0x3b   :  { %v2893_v10 = vpack.c.bf16 %v94_v8, %v93_v7  ;;  %2435 = vmatprep.subr.bf16.mxu1 %v2434_v6  ;;  %v2916_v18 = vld [vmem:[%s3141_s8] ss:$0 sm:$0xff]  ;;  %v2933_v36 = vld [vmem:[%s3135_s2 + $0x8] sm:$0xff]  ;;  %s2128_s16 = sshll.u32 %s2742_s4, 4  ;;  %s2129_s16 = int_to_ptr.vmem [resolvable:$true] %s2128_s16 }
  0x3c   :  { %2437 = vmatpush3.bf16.msra.mxu1 %v2434_v6  ;;  %2447 = vmatprep.subr.bf16.mxu0 %v2895_v12  ;;  %v2927_v35 = vld [vmem:[%s3135_s2] sm:$0xff]  ;;  %s2735_s2 = smov 96   ;;  %p2705_p11 = scmp.lt.s32.totalorder %s2129_s16, %s2129_s16 }
  0x3d   :  { %2439 = vmatprep.subr.bf16.mxu1 %v2893_v10  ;;  %2449 = vmatpush3.bf16.msra.mxu0 %v2895_v12  ;;  %v2141_v37 = vld [vmem:[%s3139_s6] ss:$0 sm:$0xff]  ;;  %s2736_s6 = smov 16  }
  0x3e   :  { %566 = vperm.xlu1 %2531, %v2927_v35  }
  0x3f   :  { %2292 = vmatmul.mubr.msk.f32.vlgmr.msra.gmra.mrb[0].mxu1 %vm105_vm0, %v88_v13 }
  0x40   :  { %2441 = vmatpush3.bf16.msra.mxu1 %v2893_v10  ;;  %2298 = vmatprep.mubr.f32.mxu1 %v2733_v0 }
  0x42   :  { %571 = vperm.xlu1 %2531, %v2933_v36  }
  0x43   :  { %2299 = vmatmul.mubr.f32.vlgmr.msra.gmra.mrb[2].mxu1 %v2733_v0 }
  0x44   :  { %2310 = vmatprep.mubr.msk.f32.mxu1 %vm105_vm0, %v2872_v1 }
  0xbd   :  { %v567_v3 = vpop.permute.xlu1 %566 }
  0xc1   :  { %v572_v4 = vpop.permute.xlu1 %571 }
 0x10d   :  { %v2305_v14 = vpop.f32.mrb[0].mxu0 }
 0x10e   :  { %v357_v15 = vpop.f32.mrb[1].mxu0 }
 0x10f   :  { %2317 = vmatprep.mubr.msk.f32.mxu0 %vm105_vm0, %v357_v15 }
 0x110   :  { %2318 = vmatmul.mubr.msk.f32.vlgmr.msra.gmra.mrb[2].mxu0 %vm105_vm0, %v2305_v14 }
 0x111   :  { %2331 = vmatprep.mubr.msk.f32.mxu0 %vm105_vm0, %v2872_v1 }
 0x112   :  { %v2293_v16 = vpop.f32.mrb[0].mxu1 }
 0x113   :  { %v178_v17 = vpop.f32.mrb[1].mxu1  ;;  %v2941_v41 = vadd.f32 %v2293_v16, %v2141_v37 }
 0x114   :  { %v2939_v38 = vadd.f32 %v2141_v37, %v178_v17 }
 0x116   :  { %v2300_v19 = vpop.f32.mrb[2].mxu1 }
 0x117   :  { %v270_v20 = vadd.f32 %v2300_v19, %v2916_v18  ;;  %v264_v21 = vpop.f32.mrb[3].mxu1 }
 0x118   :  { %v265_v22 = vadd.f32 %v2916_v18, %v264_v21 }
 0x119   :  { %v2146_v23 = vmul.f32 -1.442695, %v270_v20 }
 0x11a   :  { %v2145_v24 = vmul.f32 -1.442695, %v265_v22 }
 0x11b   :  { %2538 = vpow2.f32 %v2146_v23 }
 0x11c   :  { %2540 = vpow2.f32 %v2145_v24 }
 0x125   :  { %v2539_v25 = vpop.eup %2538 }
 0x126   :  { %v2541_v26 = vpop.eup %2540  ;;  %v280_v27 = vadd.f32 1.0, %v2539_v25 }
 0x127   :  { %v279_v28 = vadd.f32 1.0, %v2541_v26 }
 0x128   :  { %2542 = vrcp.f32 %v280_v27 }
 0x129   :  { %2544 = vrcp.f32 %v279_v28 }
 0x132   :  { %v2543_v29 = vpop.eup %2542 }
 0x133   :  { %v2545_v30 = vpop.eup %2544  ;;  %v367_v31 = vmul.f32 0.0, %v2543_v29 }
 0x134   :  { %v366_v32 = vmul.f32 0.0, %v2545_v30 }
 0x136   :  { %v2442_v33 = vpack.c.bf16 %v367_v31, %v366_v32 }
 0x138   :  { %2443 = vmatprep.subr.bf16.mxu1 %v2442_v33 }
 0x139   :  { %2445 = vmatpush3.bf16.msra.mxu1 %v2442_v33 }
 0x13a   :  { %2451 = vmatprep.subr.bf16.mxu1 %v2893_v10 }
 0x13c   :  { %2311 = vmatmul.mubr.msk.f32.vlgmr.msra.gmra.mrb[4].mxu1 %vm105_vm0, %v2877_v2 }
 0x13d   :  { %2453 = vmatpush3.bf16.msra.mxu1 %v2893_v10 }
 0x1e3   :  { %v2319_v39 = vpop.f32.mrb[2].mxu0 }
 0x1e4   :  { %v515_v40 = vpop.f32.mrb[3].mxu0  ;;  %v525_v43 = vadd.f32 %v2319_v39, %v2941_v41  ;;  %v2738_v39 = vmov 2  }
 0x1e5   :  { %v524_v42 = vadd.f32 %v515_v40, %v2939_v38  ;;  %2533 = vset.pattern.permute.xlu1 %v2738_v39  ;;  %2532 = vset.pattern.permute.xlu0 %v2738_v39 }
 0x1e6   :  { %v2154_v49 = vmul.f32 -1.442695, %v525_v43 }
 0x1e7   :  { %2546 = vtanh.f32 %v524_v42  ;;  %v2153_v48 = vmul.f32 -1.442695, %v524_v42 }
 0x1e8   :  { %2548 = vtanh.f32 %v525_v43 }
 0x1e9   :  { %2550 = vpow2.f32 %v2153_v48 }
 0x1ea   :  { %2552 = vpow2.f32 %v2154_v49 }
 0x1f1   :  { %v2547_v44 = vpop.eup %2546 }
 0x1f2   :  { %542 = vrot.lane.b32.xlu0 %v2547_v44, %s2735_s2  ;;  %v2549_v45 = vpop.eup %2548 }
 0x1f3   :  { %v2551_v50 = vpop.eup %2550 }
 0x1f4   :  { %v532_v51 = vadd.f32 1.0, %v2551_v50  ;;  %v2553_v52 = vpop.eup %2552 }
 0x1f5   :  { %v533_v53 = vadd.f32 1.0, %v2553_v52 }
 0x1f6   :  { %544 = vrot.lane.b32.xlu0 %v2549_v45, %s2735_s2  ;;  %2554 = vrcp.f32 %v532_v51 }
 0x1f7   :  { %2556 = vrcp.f32 %v533_v53 }
 0x200   :  { %v2555_v54 = vpop.eup %2554 }
 0x201   :  { %v2557_v58 = vpop.eup %2556 }
 0x20f   :  { %v2312_v46 = vpop.f32.mrb[4].mxu1 }
 0x210   :  { %v434_v47 = vpop.f32.mrb[5].mxu1 }
 0x264   :  { %v543_v55 = vpop.permute.xlu0 %542 }
 0x265   :  { %v548_v56 = vmul.f32 %v2555_v54, %v543_v55 }
 0x267   :  { %v550_v57 = vadd.f32 %v548_v56, %v434_v47 }
 0x268   :  { %v545_v59 = vpop.permute.xlu0 %544 }
 0x269   :  { %2558 = vtanh.f32 %v550_v57  ;;  %v549_v60 = vmul.f32 %v2557_v58, %v545_v59  ;;  %v2973_v31 = vmul.f32 %v567_v3, %v550_v57 }
 0x26b   :  { %v551_v61 = vadd.f32 %v2312_v46, %v549_v60 }
 0x26d   :  { %2560 = vtanh.f32 %v551_v61  ;;  %v2971_v29 = vmul.f32 %v572_v4, %v551_v61 }
 0x273   :  { %v2559_v62 = vpop.eup %2558 }
 0x274   :  { %556 = vrot.lane.b32.xlu0 %v2559_v62, %s2736_s6 }
 0x277   :  { %v2561_v63 = vpop.eup %2560 }
 0x278   :  { %558 = vrot.lane.b32.xlu1 %v2561_v63, %s2736_s6 }
 0x2e6   :  { %v557_v5 = vpop.permute.xlu0 %556 }
 0x2e7   :  { %v562_v6 = vmul.f32 %v2555_v54, %v557_v5 }
 0x2e9   :  { %v2949_v7 = vmul.f32 %v567_v3, %v562_v6 }
 0x2ea   :  { %v559_v8 = vpop.permute.xlu1 %558 }
 0x2eb   :  { %v563_v9 = vmul.f32 %v2557_v58, %v559_v8  ;;  %584 = vrot.lane.b32.xlu0 %v2949_v7, %s2737_s21 }
 0x2ed   :  { %v2953_v11 = vmul.f32 %v572_v4, %v563_v9 }
 0x2ef   :  { %586 = vrot.lane.b32.xlu1 %v2953_v11, %s2737_s21 }
 0x35d   :  { %v585_v13 = vpop.permute.xlu0 %584 }
 0x35e   :  { %2324 = vmatprep.mubr.msk.f32.mxu1 %vm105_vm0, %v585_v13 }
 0x361   :  { %v587_v14 = vpop.permute.xlu1 %586 }
 0x362   :  { %v2454_v15 = vpack.c.bf16 %v587_v14, %v585_v13  ;;  %2325 = vmatmul.mubr.msk.f32.vlgmr.msra.gmra.mrb[6].mxu1 %vm105_vm0, %v587_v14 }
 0x363   :  { %2338 = vmatprep.mubr.msk.f32.mxu1 %vm105_vm0, %v2872_v1 }
 0x364   :  { %2455 = vmatprep.subr.bf16.mxu0 %v2454_v15 }
 0x365   :  { %2457 = vmatpush3.bf16.msra.mxu0 %v2454_v15 }
 0x366   :  { %2463 = vmatprep.subr.bf16.mxu0 %v2895_v12 }
 0x368   :  { %2332 = vmatmul.mubr.msk.f32.vlgmr.msra.gmra.mrb[4].mxu0 %vm105_vm0, %v2877_v2 }
 0x369   :  { %2465 = vmatpush3.bf16.msra.mxu0 %v2895_v12 }
 0x435   :  { %v2326_v16 = vpop.f32.mrb[6].mxu1 }
 0x436   :  { %v664_v17 = vadd.f32 %v2326_v16, %v2916_v18  ;;  %v658_v19 = vpop.f32.mrb[7].mxu1 }
 0x437   :  { %v659_v20 = vadd.f32 %v2916_v18, %v658_v19 }
 0x438   :  { %v2158_v21 = vmul.f32 -1.442695, %v664_v17 }
 0x439   :  { %v2157_v22 = vmul.f32 -1.442695, %v659_v20 }
 0x43a   :  { %2562 = vpow2.f32 %v2158_v21 }
 0x43b   :  { %2564 = vpow2.f32 %v2157_v22  ;;  %v2333_v23 = vpop.f32.mrb[4].mxu0 }
 0x43c   :  { %v747_v24 = vpop.f32.mrb[5].mxu0 }
 0x43d   :  { %2345 = vmatprep.mubr.msk.f32.mxu0 %vm105_vm0, %v747_v24 }
 0x43e   :  { %2346 = vmatmul.mubr.msk.f32.vlgmr.msra.gmra.mrb[6].mxu0 %vm105_vm0, %v2333_v23 }
 0x43f   :  { %2359 = vmatprep.mubr.msk.f32.mxu0 %vm105_vm0, %v2872_v1 }
 0x444   :  { %v2563_v25 = vpop.eup %2562 }
 0x445   :  { %v2565_v26 = vpop.eup %2564  ;;  %v674_v27 = vadd.f32 1.0, %v2563_v25 }
 0x446   :  { %v673_v28 = vadd.f32 1.0, %v2565_v26 }
 0x447   :  { %2566 = vrcp.f32 %v674_v27 }
 0x448   :  { %2568 = vrcp.f32 %v673_v28 }
 0x451   :  { %v2567_v30 = vpop.eup %2566 }
 0x452   :  { %v2569_v32 = vpop.eup %2568  ;;  %v757_v33 = vmul.f32 %v2567_v30, %v2971_v29 }
 0x453   :  { %v756_v34 = vmul.f32 %v2569_v32, %v2973_v31 }
 0x455   :  { %v2458_v37 = vpack.c.bf16 %v757_v33, %v756_v34 }
 0x457   :  { %2459 = vmatprep.subr.bf16.mxu1 %v2458_v37 }
 0x458   :  { %2461 = vmatpush3.bf16.msra.mxu1 %v2458_v37 }
 0x459   :  { %2467 = vmatprep.subr.bf16.mxu1 %v2893_v10 }
 0x45b   :  { %2339 = vmatmul.mubr.msk.f32.vlgmr.msra.gmra.mrb[8].mxu1 %vm105_vm0, %v2877_v2 }
 0x45c   :  { %2469 = vmatpush3.bf16.msra.mxu1 %v2893_v10 }
 0x511   :  { %v2347_v40 = vpop.f32.mrb[6].mxu0 }
 0x512   :  { %v915_v42 = vadd.f32 %v2347_v40, %v2941_v41  ;;  %v905_v43 = vpop.f32.mrb[7].mxu0 }
 0x513   :  { %v914_v44 = vadd.f32 %v905_v43, %v2939_v38 }
 0x514   :  { %2570 = vtanh.f32 %v915_v42  ;;  %v2166_v49 = vmul.f32 -1.442695, %v915_v42 }
 0x515   :  { %2572 = vtanh.f32 %v914_v44  ;;  %v2165_v50 = vmul.f32 -1.442695, %v914_v44 }
 0x516   :  { %2574 = vpow2.f32 %v2166_v49 }
 0x517   :  { %2576 = vpow2.f32 %v2165_v50 }
 0x51e   :  { %v2571_v45 = vpop.eup %2570 }
 0x51f   :  { %v2573_v46 = vpop.eup %2572  ;;  %934 = vrot.lane.b32.xlu1 %v2571_v45, %s2735_s2 }
 0x520   :  { %932 = vrot.lane.b32.xlu0 %v2573_v46, %s2735_s2  ;;  %v2575_v51 = vpop.eup %2574 }
 0x521   :  { %v2577_v52 = vpop.eup %2576  ;;  %v923_v53 = vadd.f32 1.0, %v2575_v51 }
 0x522   :  { %v922_v54 = vadd.f32 1.0, %v2577_v52 }
 0x523   :  { %961 = vperm.xlu1 %2533, %v2933_v36   ;;  %2578 = vrcp.f32 %v923_v53 }
 0x524   :  { %957 = vperm.xlu0 %2532, %v2927_v35   ;;  %2580 = vrcp.f32 %v922_v54 }
 0x52d   :  { %v2579_v55 = vpop.eup %2578 }
 0x52e   :  { %v2340_v47 = vpop.f32.mrb[8].mxu1  ;;  %v2581_v57 = vpop.eup %2580 }
 0x52f   :  { %v824_v48 = vpop.f32.mrb[9].mxu1 }
 0x591   :  { %v935_v56 = vpop.permute.xlu1 %934 }
 0x592   :  { %v939_v58 = vmul.f32 %v2579_v55, %v935_v56  ;;  %v933_v59 = vpop.permute.xlu0 %932 }
 0x593   :  { %v938_v60 = vmul.f32 %v2581_v57, %v933_v59 }
 0x594   :  { %v941_v61 = vadd.f32 %v2340_v47, %v939_v58 }
 0x595   :  { %v940_v62 = vadd.f32 %v938_v60, %v824_v48 }
 0x596   :  { %2582 = vtanh.f32 %v941_v61  ;;  %v969_v39 = vsub.f32 %v941_v61, %v2971_v29 }
 0x597   :  { %2584 = vtanh.f32 %v940_v62  ;;  %v968_v40 = vsub.f32 %v940_v62, %v2973_v31 }
 0x5a0   :  { %v2583_v63 = vpop.eup %2582 }
 0x5a1   :  { %v2585_v3 = vpop.eup %2584  ;;  %948 = vrot.lane.b32.xlu0 %v2583_v63, %s2736_s6 }
 0x5a2   :  { %946 = vrot.lane.b32.xlu1 %v2585_v3, %s2736_s6  ;;  %v962_v5 = vpop.permute.xlu1 %961 }
 0x5a3   :  { %v958_v4 = vpop.permute.xlu0 %957  ;;  %v971_v42 = vmul.f32 %v969_v39, %v962_v5 }
 0x5a4   :  { %v970_v43 = vmul.f32 %v968_v40, %v958_v4 }
 0x5a5   :  { %v3018_v44 = vadd.f32 %v971_v42, %v2971_v29  ;;  %v2739_v29 = vmov 1  }
 0x5a6   :  { %v3021_v46 = vadd.f32 %v970_v43, %v2973_v31  ;;  %2535 = vset.pattern.permute.xlu0 %v2739_v29  ;;  %2534 = vset.pattern.permute.xlu1 %v2739_v29 }
 0x613   :  { %v949_v6 = vpop.permute.xlu0 %948 }
 0x614   :  { %v953_v8 = vmul.f32 %v2579_v55, %v949_v6  ;;  %v947_v9 = vpop.permute.xlu1 %946 }
 0x615   :  { %v952_v13 = vmul.f32 %v2581_v57, %v947_v9 }
 0x616   :  { %v955_v14 = vsub.f32 %v953_v8, %v2953_v11 }
 0x617   :  { %v954_v15 = vsub.f32 %v952_v13, %v2949_v7 }
 0x618   :  { %v965_v16 = vmul.f32 %v962_v5, %v955_v14 }
 0x619   :  { %v964_v17 = vmul.f32 %v958_v4, %v954_v15 }
 0x61a   :  { %v2992_v19 = vadd.f32 %v965_v16, %v2953_v11 }
 0x61b   :  { %v2995_v20 = vadd.f32 %v964_v17, %v2949_v7 }
 0x61c   :  { %978 = vrot.lane.b32.xlu0 %v2992_v19, %s2737_s21 }
 0x61d   :  { %976 = vrot.lane.b32.xlu1 %v2995_v20, %s2737_s21 }
 0x68e   :  { %v979_v21 = vpop.permute.xlu0 %978 }
 0x68f   :  { %v977_v22 = vpop.permute.xlu1 %976 }
 0x690   :  { %v2470_v23 = vpack.c.bf16 %v979_v21, %v977_v22  ;;  %2352 = vmatprep.mubr.msk.f32.mxu1 %vm105_vm0, %v977_v22 }
 0x691   :  { %2353 = vmatmul.mubr.msk.f32.vlgmr.msra.gmra.mrb[10].mxu1 %vm105_vm0, %v979_v21 }
 0x692   :  { %2471 = vmatprep.subr.bf16.mxu0 %v2470_v23  ;;  %2366 = vmatprep.mubr.msk.f32.mxu1 %vm105_vm0, %v2872_v1 }
 0x693   :  { %2473 = vmatpush3.bf16.msra.mxu0 %v2470_v23 }
 0x694   :  { %2479 = vmatprep.subr.bf16.mxu0 %v2895_v12 }
 0x696   :  { %2360 = vmatmul.mubr.msk.f32.vlgmr.msra.gmra.mrb[8].mxu0 %vm105_vm0, %v2877_v2 }
 0x697   :  { %2481 = vmatpush3.bf16.msra.mxu0 %v2895_v12 }
 0x764   :  { %v2354_v7 = vpop.f32.mrb[10].mxu1 }
 0x765   :  { %v1056_v11 = vadd.f32 %v2354_v7, %v2916_v18  ;;  %v1050_v24 = vpop.f32.mrb[11].mxu1 }
 0x766   :  { %v1051_v25 = vadd.f32 %v2916_v18, %v1050_v24 }
 0x767   :  { %v2170_v26 = vmul.f32 -1.442695, %v1056_v11 }
 0x768   :  { %v2169_v27 = vmul.f32 -1.442695, %v1051_v25 }
 0x769   :  { %2586 = vpow2.f32 %v2170_v26  ;;  %v2361_v28 = vpop.f32.mrb[8].mxu0 }
 0x76a   :  { %2588 = vpow2.f32 %v2169_v27  ;;  %v1139_v30 = vpop.f32.mrb[9].mxu0 }
 0x76b   :  { %2373 = vmatprep.mubr.msk.f32.mxu0 %vm105_vm0, %v1139_v30 }
 0x76c   :  { %2374 = vmatmul.mubr.msk.f32.vlgmr.msra.gmra.mrb[10].mxu0 %vm105_vm0, %v2361_v28 }
 0x76d   :  { %2387 = vmatprep.mubr.msk.f32.mxu0 %vm105_vm0, %v2872_v1 }
 0x773   :  { %v2587_v32 = vpop.eup %2586 }
 0x774   :  { %v2589_v33 = vpop.eup %2588  ;;  %v1066_v34 = vadd.f32 1.0, %v2587_v32 }
 0x775   :  { %v1065_v37 = vadd.f32 1.0, %v2589_v33 }
 0x776   :  { %2590 = vrcp.f32 %v1066_v34 }
 0x777   :  { %2592 = vrcp.f32 %v1065_v37 }
 0x780   :  { %v2591_v45 = vpop.eup %2590 }
 0x781   :  { %v2593_v47 = vpop.eup %2592  ;;  %v1149_v48 = vmul.f32 %v2591_v45, %v3018_v44 }
 0x782   :  { %v1148_v49 = vmul.f32 %v2593_v47, %v3021_v46 }
 0x784   :  { %v2474_v50 = vpack.c.bf16 %v1149_v48, %v1148_v49 }
 0x786   :  { %2475 = vmatprep.subr.bf16.mxu1 %v2474_v50 }
 0x787   :  { %2477 = vmatpush3.bf16.msra.mxu1 %v2474_v50 }
 0x788   :  { %2483 = vmatprep.subr.bf16.mxu1 %v2893_v10 }
 0x78a   :  { %2367 = vmatmul.mubr.msk.f32.vlgmr.msra.gmra.mrb[12].mxu1 %vm105_vm0, %v2877_v2 }
 0x78b   :  { %2485 = vmatpush3.bf16.msra.mxu1 %v2893_v10 }
 0x83f   :  { %v2375_v31 = vpop.f32.mrb[10].mxu0 }
 0x840   :  { %v1307_v51 = vadd.f32 %v2375_v31, %v2941_v41  ;;  %v1297_v52 = vpop.f32.mrb[11].mxu0 }
 0x841   :  { %v1306_v53 = vadd.f32 %v1297_v52, %v2939_v38 }
 0x842   :  { %2594 = vtanh.f32 %v1307_v51  ;;  %v2178_v57 = vmul.f32 -1.442695, %v1307_v51 }
 0x843   :  { %2596 = vtanh.f32 %v1306_v53  ;;  %v2177_v58 = vmul.f32 -1.442695, %v1306_v53 }
 0x844   :  { %2598 = vpow2.f32 %v2178_v57 }
 0x845   :  { %2600 = vpow2.f32 %v2177_v58 }
 0x84c   :  { %v2595_v54 = vpop.eup %2594 }
 0x84d   :  { %v2597_v55 = vpop.eup %2596  ;;  %1326 = vrot.lane.b32.xlu0 %v2595_v54, %s2735_s2 }
 0x84e   :  { %1324 = vrot.lane.b32.xlu1 %v2597_v55, %s2735_s2  ;;  %v2599_v59 = vpop.eup %2598 }
 0x84f   :  { %v2601_v60 = vpop.eup %2600  ;;  %v1315_v61 = vadd.f32 1.0, %v2599_v59 }
 0x850   :  { %v1314_v62 = vadd.f32 1.0, %v2601_v60 }
 0x851   :  { %1353 = vperm.xlu0 %2535, %v2933_v36   ;;  %2602 = vrcp.f32 %v1315_v61 }
 0x852   :  { %1349 = vperm.xlu1 %2534, %v2927_v35   ;;  %2604 = vrcp.f32 %v1314_v62 }
 0x85b   :  { %v2603_v63 = vpop.eup %2602 }
 0x85c   :  { %v2605_v4 = vpop.eup %2604 }
 0x85d   :  { %v2368_v10 = vpop.f32.mrb[12].mxu1 }
 0x85e   :  { %v1216_v56 = vpop.f32.mrb[13].mxu1 }
 0x8bf   :  { %v1327_v3 = vpop.permute.xlu0 %1326 }
 0x8c0   :  { %v1325_v5 = vpop.permute.xlu1 %1324  ;;  %v1331_v6 = vmul.f32 %v2603_v63, %v1327_v3 }
 0x8c1   :  { %v1330_v8 = vmul.f32 %v2605_v4, %v1325_v5 }
 0x8c2   :  { %v1333_v13 = vadd.f32 %v2368_v10, %v1331_v6  ;;  %v2740_v10 = vmov 0  }
 0x8c3   :  { %v1332_v9 = vadd.f32 %v1330_v8, %v1216_v56  ;;  %2536 = vset.pattern.permute.xlu0 %v2740_v10  ;;  %2537 = vset.pattern.permute.xlu1 %v2740_v10  ;;  %v2037_v10 = vld [vmem:[%s3146_s13 + $0x10] sm:$0xff] }
 0x8c4   :  { %v1361_v48 = vsub.f32 %v1333_v13, %v3018_v44 }
 0x8c5   :  { %2606 = vtanh.f32 %v1332_v9 }
 0x8c6   :  { %2608 = vtanh.f32 %v1333_v13 }
 0x8cf   :  { %v2607_v14 = vpop.eup %2606 }
 0x8d0   :  { %1338 = vrot.lane.b32.xlu1 %v2607_v14, %s2736_s6  ;;  %v2609_v15 = vpop.eup %2608  ;;  %v1354_v26 = vpop.permute.xlu0 %1353 }
 0x8d1   :  { %v1350_v16 = vpop.permute.xlu1 %1349  ;;  %v1363_v49 = vmul.f32 %v1361_v48, %v1354_v26 }
 0x8d3   :  { %v1365_v29 = vadd.f32 %v1363_v49, %v3018_v44  ;;  %v2035_v49 = vld [vmem:[%s3146_s13] sm:$0xff] }
 0x8d4   :  { %1340 = vrot.lane.b32.xlu1 %v2609_v15, %s2736_s6 }
 0x942   :  { %v1339_v17 = vpop.permute.xlu1 %1338 }
 0x943   :  { %v1344_v21 = vmul.f32 %v2605_v4, %v1339_v17  ;;  %v1753_v17 = vld [vmem:[%s3142_s9 + $0x8] sm:$0xff] }
 0x945   :  { %v1346_v22 = vsub.f32 %v1344_v21, %v2995_v20 }
 0x946   :  { %v1341_v23 = vpop.permute.xlu1 %1340 }
 0x947   :  { %v1356_v7 = vmul.f32 %v1350_v16, %v1346_v22  ;;  %v1345_v11 = vmul.f32 %v2603_v63, %v1341_v23 }
 0x949   :  { %v1347_v24 = vsub.f32 %v1345_v11, %v2992_v19  ;;  %v3040_v25 = vadd.f32 %v1356_v7, %v2995_v20 }
 0x94b   :  { %v1357_v27 = vmul.f32 %v1354_v26, %v1347_v24  ;;  %1368 = vrot.lane.b32.xlu0 %v3040_v25, %s2737_s21 }
 0x94d   :  { %v3045_v28 = vadd.f32 %v1357_v27, %v2992_v19 }
 0x94f   :  { %1370 = vrot.lane.b32.xlu1 %v3045_v28, %s2737_s21 }
 0x9bd   :  { %v1369_v30 = vpop.permute.xlu0 %1368 }
 0x9be   :  { %2380 = vmatprep.mubr.msk.f32.mxu1 %vm105_vm0, %v1369_v30 }
 0x9c1   :  { %v1371_v32 = vpop.permute.xlu1 %1370 }
 0x9c2   :  { %v2486_v33 = vpack.c.bf16 %v1371_v32, %v1369_v30  ;;  %2381 = vmatmul.mubr.msk.f32.vlgmr.msra.gmra.mrb[14].mxu1 %vm105_vm0, %v1371_v32 }
 0x9c3   :  { %2394 = vmatprep.mubr.msk.f32.mxu1 %vm105_vm0, %v2872_v1 }
 0x9c4   :  { %2487 = vmatprep.subr.bf16.mxu0 %v2486_v33 }
 0x9c5   :  { %2489 = vmatpush3.bf16.msra.mxu0 %v2486_v33 }
 0x9c6   :  { %2495 = vmatprep.subr.bf16.mxu0 %v2895_v12 }
 0x9c8   :  { %2388 = vmatmul.mubr.msk.f32.vlgmr.msra.gmra.mrb[12].mxu0 %vm105_vm0, %v2877_v2 }
 0x9c9   :  { %2497 = vmatpush3.bf16.msra.mxu0 %v2895_v12 }
 0xa95   :  { %v2382_v19 = vpop.f32.mrb[14].mxu1 }
 0xa96   :  { %v1448_v20 = vadd.f32 %v2382_v19, %v2916_v18  ;;  %v1442_v34 = vpop.f32.mrb[15].mxu1 }
 0xa97   :  { %v1443_v37 = vadd.f32 %v2916_v18, %v1442_v34  ;;  %v1360_v18 = vsub.f32 %v1332_v9, %v3021_v46  ;;  %v1847_v34 = vld [vmem:[%s3136_s3 + $0x8] sm:$0xff] }
 0xa98   :  { %v2182_v39 = vmul.f32 -1.442695, %v1448_v20 }
 0xa99   :  { %v2181_v40 = vmul.f32 -1.442695, %v1443_v37  ;;  %v1362_v50 = vmul.f32 %v1360_v18, %v1350_v16  ;;  %v1752_v16 = vld [vmem:[%s3142_s9] sm:$0xff] }
 0xa9a   :  { %2610 = vpow2.f32 %v2182_v39  ;;  %v2498_v21 = vpack.c.bf16 %v1753_v17, %v1752_v16  ;;  %v1862_v37 = vld [vmem:[%s3144_s11] sm:$0xff]  ;;  %v1863_v39 = vld [vmem:[%s3144_s11 + $0x8] sm:$0x1] }
 0xa9b   :  { %2612 = vpow2.f32 %v2181_v40  ;;  %v2389_v1 = vpop.f32.mrb[12].mxu0  ;;  %v1364_v51 = vadd.f32 %v1362_v50, %v3021_v46  ;;  %v1950_v18 = vld [vmem:[%s3145_s12] sm:$0xff]  ;;  %v2036_v50 = vld [vmem:[%s3146_s13 + $0x8] sm:$0xff] }
 0xa9c   :  { %v1531_v42 = vpop.f32.mrb[13].mxu0 }
 0xa9d   :  { %2401 = vmatprep.mubr.msk.f32.mxu0 %vm105_vm0, %v1531_v42  ;;  %v1848_v42 = vlaneseq }
 0xa9e   :  { %2402 = vmatmul.mubr.msk.f32.vlgmr.msra.gmra.mrb[14].mxu0 %vm105_vm0, %v2389_v1 }
 0xaa4   :  { %v2611_v43 = vpop.eup %2610 }
 0xaa5   :  { %v2613_v45 = vpop.eup %2612  ;;  %v1458_v47 = vadd.f32 1.0, %v2611_v43  ;;  %v1849_v43 = vand.u32 127, %v1848_v42 }
 0xaa6   :  { %v1457_v12 = vadd.f32 1.0, %v2613_v45 }
 0xaa7   :  { %2614 = vrcp.f32 %v1458_v47 }
 0xaa8   :  { %2616 = vrcp.f32 %v1457_v12 }
 0xab1   :  { %v2615_v31 = vpop.eup %2614 }
 0xab2   :  { %v2617_v52 = vpop.eup %2616  ;;  %v1541_v53 = vmul.f32 %v2615_v31, %v1365_v29  ;;  %v2508_v29 = vpack.c.bf16 %v2036_v50, %v2035_v49 }
 0xab3   :  { %v1540_v54 = vmul.f32 %v2617_v52, %v1364_v51 }
 0xab5   :  { %v2490_v55 = vpack.c.bf16 %v1541_v53, %v1540_v54 }
 0xab7   :  { %2491 = vmatprep.subr.bf16.mxu1 %v2490_v55 }
 0xab8   :  { %2493 = vmatpush3.bf16.msra.mxu1 %v2490_v55 }
 0xab9   :  { %2499 = vmatprep.subr.bf16.mxu1 %v2498_v21 }
 0xabb   :  { %2395 = vmatmul.mubr.msk.f32.vlgmr.msra.gmra.mrb[16].mxu1 %vm105_vm0, %v2877_v2 }
 0xabc   :  { %2501 = vmatpush3.bf16.msra.mxu1 %v2498_v21 }
 0xabd   :  { %2418 = vmatprep.subr.mxu1 %v1950_v18 }
 0xb71   :  { %v2403_v56 = vpop.f32.mrb[14].mxu0 }
 0xb72   :  { %v1699_v57 = vadd.f32 %v2403_v56, %v2941_v41  ;;  %v1689_v58 = vpop.f32.mrb[15].mxu0  ;;  %v2038_v56 = vld [vmem:[%s3146_s13 + $0x18] sm:$0xff] }
 0xb73   :  { %v1698_v44 = vadd.f32 %v1689_v58, %v2939_v38 }
 0xb74   :  { %2618 = vtanh.f32 %v1699_v57  ;;  %v2190_v61 = vmul.f32 -1.442695, %v1699_v57  ;;  %v2512_v57 = vpack.c.bf16 %v2038_v56, %v2037_v10 }
 0xb75   :  { %2620 = vtanh.f32 %v1698_v44  ;;  %v2189_v62 = vmul.f32 -1.442695, %v1698_v44 }
 0xb76   :  { %2622 = vpow2.f32 %v2190_v61 }
 0xb77   :  { %2624 = vpow2.f32 %v2189_v62 }
 0xb7e   :  { %v2619_v46 = vpop.eup %2618 }
 0xb7f   :  { %v2621_v59 = vpop.eup %2620  ;;  %1718 = vrot.lane.b32.xlu1 %v2619_v46, %s2735_s2 }
 0xb80   :  { %1716 = vrot.lane.b32.xlu0 %v2621_v59, %s2735_s2  ;;  %v2623_v41 = vpop.eup %2622  ;;  %s2700_s2 = scalar_lea.vmem %s2129_s16, 256 }
 0xb81   :  { %v2625_v38 = vpop.eup %2624  ;;  %v1707_v63 = vadd.f32 1.0, %v2623_v41  ;;  %p2701_p10 = scmp.ne.s32.totalorder %s2129_s16, %s2700_s2  ;;  %p2706_p12 = scmp.lt.s32.totalorder %s2700_s2, %s2700_s2 }
 0xb82   :  { %v1706_v3 = vadd.f32 1.0, %v2625_v38 }
 0xb83   :  { %1745 = vperm.xlu1 %2537, %v2933_v36   ;;  %2626 = vrcp.f32 %v1707_v63  ;;  %p2707_p13 = por %p2706_p12, %p2705_p11 }
 0xb84   :  { %1741 = vperm.xlu0 %2536, %v2927_v35   ;;  %2628 = vrcp.f32 %v1706_v3 }
 0xb85   :  { %p2708_p0 = pnand %p2707_p13, %p2701_p10 }
 0xb8d   :  { %v2627_v4 = vpop.eup %2626 }
 0xb8e   :  { %v2396_v2 = vpop.f32.mrb[16].mxu1  ;;  %v2629_v6 = vpop.eup %2628 }
 0xb8f   :  { %v1608_v60 = vpop.f32.mrb[17].mxu1 }
 0xbf1   :  { %v1719_v5 = vpop.permute.xlu1 %1718 }
 0xbf2   :  { %v1723_v8 = vmul.f32 %v2627_v4, %v1719_v5  ;;  %v1717_v9 = vpop.permute.xlu0 %1716 }
 0xbf3   :  { %v1722_v36 = vmul.f32 %v2629_v6, %v1717_v9 }
 0xbf4   :  { %v1725_v13 = vadd.f32 %v2396_v2, %v1723_v8 }
 0xbf5   :  { %v1724_v35 = vadd.f32 %v1722_v36, %v1608_v60 }
 0xbf6   :  { %2630 = vtanh.f32 %v1725_v13 }
 0xbf7   :  { %2632 = vtanh.f32 %v1724_v35 }
 0xc00   :  { %v2631_v14 = vpop.eup %2630 }
 0xc01   :  { %v2633_v15 = vpop.eup %2632  ;;  %1732 = vrot.lane.b32.xlu0 %v2631_v14, %s2736_s6 }
 0xc02   :  { %1730 = vrot.lane.b32.xlu1 %v2633_v15, %s2736_s6  ;;  %v1746_v23 = vpop.permute.xlu1 %1745 }
 0xc03   :  { %v1742_v22 = vpop.permute.xlu0 %1741 }
 0xc73   :  { %v1733_v7 = vpop.permute.xlu0 %1732 }
 0xc74   :  { %v1737_v11 = vmul.f32 %v2627_v4, %v1733_v7  ;;  %v1731_v24 = vpop.permute.xlu1 %1730 }
 0xc75   :  { %v1736_v26 = vmul.f32 %v2629_v6, %v1731_v24 }
 0xc76   :  { %v1739_v27 = vsub.f32 %v1737_v11, %v3045_v28 }
 0xc77   :  { %v1738_v30 = vsub.f32 %v1736_v26, %v3040_v25 }
 0xc78   :  { %v1749_v32 = vmul.f32 %v1746_v23, %v1739_v27 }
 0xc79   :  { %v1748_v33 = vmul.f32 %v1742_v22, %v1738_v30 }
 0xc7a   :  { %v1751_v19 = vadd.f32 %v1749_v32, %v3045_v28  ;;  %v2502_v28 = vpack.c.bf16 %v1863_v39, %v1862_v37 }
 0xc7b   :  { %v1750_v20 = vadd.f32 %v1748_v33, %v3040_v25  ;;  %v1846_v25 = vld [vmem:[%s3136_s3] sm:$0xff] }
 0xc7c   :  { %1765 = vrot.lane.b32.xlu0 %v1751_v19, %s2737_s21  ;;  %2504 = vmatprep.subr.msk.bf16.mxu0 %vm2503_vm3, %v2502_v28 }
 0xc7d   :  { %1763 = vrot.lane.b32.xlu1 %v1750_v20, %s2737_s21  ;;  %2507 = vmatpush3.bf16.msk.msra.mxu0 %vm2503_vm3, %v2502_v28 }
 0xc7e   :  { %2509 = vmatprep.subr.bf16.mxu0 %v2508_v29 }
 0xc80   :  { %1854 = vperm.xlu0 %2536, %v1847_v34  }
 0xc81   :  { %1851 = vperm.xlu1 %2537, %v1846_v25  }
 0xcee   :  { %v1766_v1 = vpop.permute.xlu0 %1765 }
 0xcef   :  { %v1764_v40 = vpop.permute.xlu1 %1763 }
 0xcf0   :  { %2408 = vmatprep.mubr.msk.f32.mxu1 %vm105_vm0, %v1764_v40 }
 0xcf1   :  { %2409 = vmatmul.mubr.msk.f32.vlgmr.msra.gmra.mrb[18].mxu1 %vm105_vm0, %v1766_v1 }
 0xcf2   :  { %2419 = vmatpush3.msra.mxu1 %v1950_v18 }
 0xcff   :  { %v1855_v45 = vpop.permute.xlu0 %1854 }
 0xd00   :  { %vm1857_vm4 = vcmp.eq.s32.totalorder %v1855_v45, %v1849_v43  ;;  %v1852_v47 = vpop.permute.xlu1 %1851 }
 0xd01   :  { %vm1856_vm6 = vcmp.eq.s32.totalorder %v1852_v47, %v1849_v43  ;;  %v2195_v48 = vsel %vm1857_vm4, 1.0, %v2733_v0 }
 0xd02   :  { %v2194_v12 = vsel %vm1856_vm6, 1.0, %v2733_v0  ;;  %v2191_v0 = vld [vmem:[#allocation7] ss:$0 sm:$0xff] }
 0xd03   :  { %2415 = vmatprep.mubr.msk.f32.mxu0 %vm1864_vm5, %v2194_v12 }
 0xd04   :  { %2416 = vmatmul.mubr.msk.f32.vlgmr.msra.gmra.mrb[16].mxu0 %vm1864_vm5, %v2195_v48 }
 0xd05   :  { %2511 = vmatpush3.bf16.msra.mxu0 %v2508_v29 }
 0xd06   :  { %2513 = vmatprep.subr.bf16.mxu0 %v2512_v57 }
 0xd09   :  { %2515 = vmatpush3.bf16.msra.mxu0 %v2512_v57 }
 0xdc4   :  { %v2410_v31 = vpop.f32.mrb[18].mxu1 }
 0xdc5   :  { %v1837_v51 = vpop.f32.mrb[19].mxu1  ;;  %v1843_v53 = vadd.f32 %v2410_v31, %v2191_v0 }
 0xdc6   :  { %v1838_v52 = vadd.f32 %v2191_v0, %v1837_v51 }
 0xdc8   :  { %2420 = vmatprep.mubr.msk.f32.mxu1 %vm1951_vm7, %v1838_v52 }
 0xdc9   :  { %2421 = vmatmul.mubr.msk.f32.vlgmr.msra.gmra.mrb[20].mxu1 %vm1951_vm7, %v1843_v53 }
 0xdd7   :  { %v2417_v54 = vpop.f32.mrb[16].mxu0 }
 0xdd8   :  { %v1941_v55 = vpop.f32.mrb[17].mxu0 }
 0xe9c   :  { %v2422_v58 = vpop.f32.mrb[20].mxu1 }
 0xe9d   :  { %v2034_v44 = vmul.f32 %v2422_v58, %v2417_v54  ;;  %v2024_v46 = vpop.f32.mrb[21].mxu1 }
 0xe9e   :  { %v2033_v59 = vmul.f32 %v2024_v46, %v1941_v55 }
 0xea0   :  { %2431 = vmatprep.mubr.msk.f32.mxu0 %vm2039_vm8, %v2033_v59 }
 0xea1   :  { %2432 = vmatmul.mubr.msk.f32.vlgmr.msra.gmra.mrb[18].mxu0 %vm2039_vm8, %v2034_v44 }
 0xf74   :  { %v2433_v2 = vpop.f32.mrb[18].mxu0 }
 0xf75   :  { %2122 = vst [vmem:[#allocation8 + $0x8] sm:$0xff] %v2433_v2  ;;  %v2112_v60 = vpop.f32.mrb[19].mxu0 }
 0xf76   :  { %2121 = vst [vmem:[#allocation8] sm:$0xff] %v2112_v60 }
 0xf77   :  { %2711 = shalt.err (!%p2708_p0)
}
 0xf78   :  { %s2712_s21 = scalar_lea.hbm %s3147_s14, 256 }
 0xf79   :  { %p2713_p1 = scmp.ne.s32.totalorder %s3147_s14, %s2712_s21  ;;  %p2716_p2 = scmp.lt.u32.totalorder %s2712_s21, %s3147_s14 }
 0xf7b   :  { %p2718_p3 = pnand %p2716_p2, %p2713_p1 }
 0xf7d   :  { %2721 = shalt.err (!%p2718_p3)
}
 0xf7e   :  { %2134 = dma.vmem_to_hbm [thread:$0]  %s2129_s16, 256, %s3147_s14, [#allocation4], %s2730_s25, %s2730_s25, %s2731_s26  }
 0xf7f   :  { %2726 = dma.done.wait [#allocation4], 256  }
 0xf80   :  { %2727 = vsyncadd [#allocation4], 4294967040 }
 0xf81   :  { %2138 = vsyncpa [#allocation3], 1 }
 0xf82   :  { %2139 = vsyncpa [#allocation6], 1 }
 0xf83   :  { %2140 = vsyncpa [#allocation4], 1 }

</bundles_post_ra>
